<compile_context>
chip_gen: v7x
topology: tpu7x:2x2x1
jax: 0.10.0
libtpu: 0.0.40
codegen_flags: <defaults>
</compile_context>

<pallas_src>
import jax
import jax.numpy as jnp
from jax.experimental import pallas as pl
from jax.experimental.pallas import tpu as pltpu

_LANE = 128      # vreg lane width
_SUBLANE = 8     # f32 sublane count


def _round_up(x, m):
    return ((x + m - 1) // m) * m


def _cdiv(a, b):
    return -(-a // b)


def _mlp_actor_kernel(act_limit_ref,
                      obs_ref, w1_ref, b1_ref, w2_ref, b2_ref, w3_ref, b3_ref,
                      out_ref):
    x = obs_ref[...]                                                     # (TB, obs_p) bf16

    # hidden layer 1: Linear (bf16 MXU, f32 acc) + bias + ReLU in f32
    h1 = jnp.dot(x, w1_ref[...], preferred_element_type=jnp.float32) + b1_ref[...]
    h1 = jnp.maximum(h1, 0.0).astype(jnp.bfloat16)

    # hidden layer 2
    h2 = jnp.dot(h1, w2_ref[...], preferred_element_type=jnp.float32) + b2_ref[...]
    h2 = jnp.maximum(h2, 0.0).astype(jnp.bfloat16)

    # output layer: Linear + Tanh, scaled by act_limit (SMEM scalar)
    o = jnp.dot(h2, w3_ref[...], preferred_element_type=jnp.float32) + b3_ref[...]
    act_limit = act_limit_ref[0, 0]
    # TODO(synk): on v5e, emitting bf16 output (and upcasting in the wrapper)
    # halves writeback bytes if action precision tolerates it.
    out_ref[...] = (act_limit * jnp.tanh(o)).astype(out_ref.dtype)


def prepare_mlp_actor_params(params):
    """Pad feature dims to 128 lanes and cast weights to bf16, ONCE (cold path).

    params: (w1, b1, w2, b2, w3, b3), w_i: (in, out) f32, b_i: (1, out) f32.
    Returns a dict consumed by mlp_actor_forward.
    """
    w1, b1, w2, b2, w3, b3 = params
    obs_dim, h1_dim = w1.shape
    h2_dim = w2.shape[1]
    act_dim = w3.shape[1]

    obs_p = _round_up(obs_dim, _LANE)
    h1_p = _round_up(h1_dim, _LANE)
    h2_p = _round_up(h2_dim, _LANE)
    act_p = _round_up(act_dim, _LANE)

    def pad2(a, rows, cols, dtype):
        a = jnp.pad(a, ((0, rows - a.shape[0]), (0, cols - a.shape[1])))
        return a.astype(dtype)

    return dict(
        # bf16 MXU operands (zero padding is exact in bf16 too)
        w1=pad2(w1, obs_p, h1_p, jnp.bfloat16),
        w2=pad2(w2, h1_p, h2_p, jnp.bfloat16),
        w3=pad2(w3, h2_p, act_p, jnp.bfloat16),
        # biases stay f32 (added to the f32 accumulator)
        b1=pad2(b1, 1, h1_p, jnp.float32),
        b2=pad2(b2, 1, h2_p, jnp.float32),
        b3=pad2(b3, 1, act_p, jnp.float32),
        dims=(obs_dim, act_dim),
        padded_dims=(obs_p, h1_p, h2_p, act_p),
    )


def mlp_actor_forward(obs, prepared, act_limit, *, batch_tile=1024):
    """Hot path. obs: (B, obs_dim) f32; prepared: output of prepare_mlp_actor_params."""
    batch, obs_dim_in = obs.shape
    obs_dim, act_dim = prepared["dims"]
    assert obs_dim_in == obs_dim, "obs feature dim mismatch vs prepared params"
    obs_p, h1_p, h2_p, act_p = prepared["padded_dims"]

    # --- balanced, sublane-aligned batch tiling ---
    batch_tile = max(_SUBLANE, _round_up(batch_tile, _SUBLANE))
    rb = _round_up(batch, _SUBLANE)
    steps = _cdiv(rb, batch_tile)
    if rb >= 2 * _SUBLANE:
        # v7x has 2 TensorCores: give the "parallel" batch axis >= 2 blocks to shard.
        steps = max(steps, 2)
    tb = _round_up(_cdiv(rb, steps), _SUBLANE)
    steps = _cdiv(rb, tb)
    padded_batch = steps * tb

    # lane-dense, bf16 obs slab (padding rows/lanes carry zeros; sliced off below)
    obs_padded = jnp.pad(
        obs, ((0, padded_batch - batch), (0, obs_p - obs_dim))
    ).astype(jnp.bfloat16)

    act_limit_arr = jnp.full((1, 1), act_limit, dtype=jnp.float32)

    # Advisory cost estimate for XLA scheduling around the custom call.
    flops = 2 * padded_batch * (obs_p * h1_p + h1_p * h2_p + h2_p * act_p)
    bytes_accessed = (2 * padded_batch * obs_p                      # bf16 obs in
                      + 4 * padded_batch * act_p                    # f32 out
                      + 2 * (obs_p * h1_p + h1_p * h2_p + h2_p * act_p)   # bf16 weights
                      + 4 * (h1_p + h2_p + act_p))                  # f32 biases
    cost = pl.CostEstimate(flops=flops,
                           transcendentals=padded_batch * act_p,
                           bytes_accessed=bytes_accessed)

    resident = lambda i: (0, 0)   # constant block index -> stays VMEM-resident

    # TODO(synk): for large hidden sizes (>=1024) on v7x, mark the resident
    # weight BlockSpecs with pipeline_mode=pl.Buffered(1) and set an explicit
    # vmem_limit_bytes; irrelevant at MADDPG-scale hidden sizes.
    out_padded = pl.pallas_call(
        _mlp_actor_kernel,
        out_shape=jax.ShapeDtypeStruct((padded_batch, act_p), jnp.float32),
        grid=(steps,),
        in_specs=[
            pl.BlockSpec((1, 1), resident, memory_space=pltpu.MemorySpace.SMEM),
            pl.BlockSpec((tb, obs_p), lambda i: (i, 0)),
            pl.BlockSpec((obs_p, h1_p), resident),
            pl.BlockSpec((1, h1_p), resident),
            pl.BlockSpec((h1_p, h2_p), resident),
            pl.BlockSpec((1, h2_p), resident),
            pl.BlockSpec((h2_p, act_p), resident),
            pl.BlockSpec((1, act_p), resident),
        ],
        out_specs=pl.BlockSpec((tb, act_p), lambda i: (i, 0)),
        compiler_params=pltpu.CompilerParams(
            dimension_semantics=("parallel",)),
        cost_estimate=cost,
    )(act_limit_arr, obs_padded,
      prepared["w1"], prepared["b1"],
      prepared["w2"], prepared["b2"],
      prepared["w3"], prepared["b3"])

    return out_padded[:batch, :act_dim]


def _init_params(key, obs_dim, hidden_sizes, act_dim):
    sizes = [obs_dim] + list(hidden_sizes) + [act_dim]
    params = []
    for j in range(len(sizes) - 1):
        key, kw, kb = jax.random.split(key, 3)
        fan_in = sizes[j]
        bound = 1.0 / jnp.sqrt(fan_in)  # torch nn.Linear default init range
        w = jax.random.uniform(kw, (sizes[j], sizes[j + 1]),
                               minval=-bound, maxval=bound, dtype=jnp.float32)
        b = jax.random.uniform(kb, (1, sizes[j + 1]),
                               minval=-bound, maxval=bound, dtype=jnp.float32)
        params += [w, b]
    return tuple(params)


def _reference_forward(obs, params, act_limit):
    w1, b1, w2, b2, w3, b3 = params
    h1 = jnp.maximum(obs @ w1 + b1, 0.0)
    h2 = jnp.maximum(h1 @ w2 + b2, 0.0)
    return act_limit * jnp.tanh(h2 @ w3 + b3)


if __name__ == "__main__":
    # Small shapes consistent with MLPActor(obs_dim, act_dim, hidden_sizes, ReLU, act_limit)
    batch, obs_dim, act_dim = 8, 16, 4
    hidden_sizes = (32, 32)
    act_limit = 2.0

    key = jax.random.PRNGKey(0)
    k_obs, k_params = jax.random.split(key)

    obs = jax.random.normal(k_obs, (batch, obs_dim), dtype=jnp.float32)
    params = _init_params(k_params, obs_dim, hidden_sizes, act_dim)

    prepared = prepare_mlp_actor_params(params)   # cold path: pad + bf16-cast once
    out = mlp_actor_forward(obs, prepared, act_limit)
    out = jax.block_until_ready(out)

    ref = _reference_forward(obs, params, act_limit)   # f32 reference
    assert out.shape == (batch, act_dim)
    # bf16 MXU operands (f32 accumulation): validate with a looser tolerance.
    assert jnp.allclose(out, ref, atol=5e-2, rtol=5e-2), "Pallas output mismatch vs reference"

    print("KERNEL_OK")
</pallas_src>

<mosaic_0001>
module attributes {stable_mosaic.version = 11 : i64} {
  func.func @_mlp_actor_kernel(%arg0: i32, %arg1: memref<1x1xf32, #tpu.memory_space<smem>>, %arg2: memref<8x128xbf16, #tpu.memory_space<vmem>>, %arg3: memref<128x128xbf16, #tpu.memory_space<vmem>>, %arg4: memref<1x128xf32, #tpu.memory_space<vmem>>, %arg5: memref<128x128xbf16, #tpu.memory_space<vmem>>, %arg6: memref<1x128xf32, #tpu.memory_space<vmem>>, %arg7: memref<128x128xbf16, #tpu.memory_space<vmem>>, %arg8: memref<1x128xf32, #tpu.memory_space<vmem>>, %arg9: memref<8x128xf32, #tpu.memory_space<vmem>>) attributes {dimension_semantics = [#tpu.dimension_semantics<parallel>], iteration_bounds = array<i64: 1>, scalar_prefetch = 0 : i64, scratch_operands = 0 : i64, tpu.core_type = #tpu.core_type<tc>, window_params = [{transform_indices = @transform_0, window_bounds = array<i64: 1, 1>}, {transform_indices = @transform_1, window_bounds = array<i64: 8, 128>}, {pipeline_mode = #tpu.pipeline_mode<synchronous>, transform_indices = @transform_2, window_bounds = array<i64: 128, 128>}, {pipeline_mode = #tpu.pipeline_mode<synchronous>, transform_indices = @transform_3, window_bounds = array<i64: 1, 128>}, {pipeline_mode = #tpu.pipeline_mode<synchronous>, transform_indices = @transform_4, window_bounds = array<i64: 128, 128>}, {pipeline_mode = #tpu.pipeline_mode<synchronous>, transform_indices = @transform_5, window_bounds = array<i64: 1, 128>}, {pipeline_mode = #tpu.pipeline_mode<synchronous>, transform_indices = @transform_6, window_bounds = array<i64: 128, 128>}, {pipeline_mode = #tpu.pipeline_mode<synchronous>, transform_indices = @transform_7, window_bounds = array<i64: 1, 128>}, {transform_indices = @transform_8, window_bounds = array<i64: 8, 128>}]} {
    %c0 = arith.constant 0 : index
    %c0_0 = arith.constant 0 : index
    %0 = vector.load %arg2[%c0, %c0_0] : memref<8x128xbf16, #tpu.memory_space<vmem>>, vector<8x128xbf16>
    %c0_1 = arith.constant 0 : index
    %c0_2 = arith.constant 0 : index
    %1 = vector.load %arg3[%c0_1, %c0_2] : memref<128x128xbf16, #tpu.memory_space<vmem>>, vector<128x128xbf16>
    %cst = arith.constant dense<0.000000e+00> : vector<8x128xf32>
    %2 = tpu.matmul %0, %1, %cst {dimension_numbers = #tpu.dot_dimension_numbers<[1], [0], [0], [1], [0, 0, 1, 1], [], []>} : vector<8x128xbf16>, vector<128x128xbf16>, vector<8x128xf32> -> vector<8x128xf32>
    %c0_3 = arith.constant 0 : index
    %c0_4 = arith.constant 0 : index
    %3 = vector.load %arg4[%c0_3, %c0_4] : memref<1x128xf32, #tpu.memory_space<vmem>>, vector<1x128xf32>
    %4 = vector.broadcast %3 : vector<1x128xf32> to vector<8x128xf32>
    %5 = arith.addf %2, %4 : vector<8x128xf32>
    %cst_5 = arith.constant 0.000000e+00 : f32
    %6 = vector.broadcast %cst_5 : f32 to vector<8x128xf32>
    %7 = arith.maximumf %5, %6 : vector<8x128xf32>
    %8 = arith.truncf %7 : vector<8x128xf32> to vector<8x128xbf16>
    %c0_6 = arith.constant 0 : index
    %c0_7 = arith.constant 0 : index
    %9 = vector.load %arg5[%c0_6, %c0_7] : memref<128x128xbf16, #tpu.memory_space<vmem>>, vector<128x128xbf16>
    %cst_8 = arith.constant dense<0.000000e+00> : vector<8x128xf32>
    %10 = tpu.matmul %8, %9, %cst_8 {dimension_numbers = #tpu.dot_dimension_numbers<[1], [0], [0], [1], [0, 0, 1, 1], [], []>} : vector<8x128xbf16>, vector<128x128xbf16>, vector<8x128xf32> -> vector<8x128xf32>
    %c0_9 = arith.constant 0 : index
    %c0_10 = arith.constant 0 : index
    %11 = vector.load %arg6[%c0_9, %c0_10] : memref<1x128xf32, #tpu.memory_space<vmem>>, vector<1x128xf32>
    %12 = vector.broadcast %11 : vector<1x128xf32> to vector<8x128xf32>
    %13 = arith.addf %10, %12 : vector<8x128xf32>
    %cst_11 = arith.constant 0.000000e+00 : f32
    %14 = vector.broadcast %cst_11 : f32 to vector<8x128xf32>
    %15 = arith.maximumf %13, %14 : vector<8x128xf32>
    %16 = arith.truncf %15 : vector<8x128xf32> to vector<8x128xbf16>
    %c0_12 = arith.constant 0 : index
    %c0_13 = arith.constant 0 : index
    %17 = vector.load %arg7[%c0_12, %c0_13] : memref<128x128xbf16, #tpu.memory_space<vmem>>, vector<128x128xbf16>
    %cst_14 = arith.constant dense<0.000000e+00> : vector<8x128xf32>
    %18 = tpu.matmul %16, %17, %cst_14 {dimension_numbers = #tpu.dot_dimension_numbers<[1], [0], [0], [1], [0, 0, 1, 1], [], []>} : vector<8x128xbf16>, vector<128x128xbf16>, vector<8x128xf32> -> vector<8x128xf32>
    %c0_15 = arith.constant 0 : index
    %c0_16 = arith.constant 0 : index
    %19 = vector.load %arg8[%c0_15, %c0_16] : memref<1x128xf32, #tpu.memory_space<vmem>>, vector<1x128xf32>
    %20 = vector.broadcast %19 : vector<1x128xf32> to vector<8x128xf32>
    %21 = arith.addf %18, %20 : vector<8x128xf32>
    %c0_17 = arith.constant 0 : index
    %c0_18 = arith.constant 0 : index
    %22 = memref.load %arg1[%c0_17, %c0_18] : memref<1x1xf32, #tpu.memory_space<smem>>
    %23 = math.tanh %21 : vector<8x128xf32>
    %24 = vector.broadcast %22 : f32 to vector<8x128xf32>
    %25 = arith.mulf %24, %23 : vector<8x128xf32>
    %c0_19 = arith.constant 0 : index
    %c0_20 = arith.constant 0 : index
    %26 = vector.load %arg9[%c0_19, %c0_20] : memref<8x128xf32, #tpu.memory_space<vmem>>, vector<8x128xf32>
    tpu.vector_store %arg9[%c0_19, %c0_20], %25 {strides = array<i32>} : memref<8x128xf32, #tpu.memory_space<vmem>>, vector<8x128xf32>,
    return
  }
  func.func @transform_0(%arg0: i32) -> (i32, i32) {
    %c0_i32 = arith.constant 0 : i32
    %c0_i32_0 = arith.constant 0 : i32
    %c0_i32_1 = arith.constant 0 : i32
    return %c0_i32, %c0_i32_0 : i32, i32
  }
  func.func @transform_1(%arg0: i32) -> (i32, i32) {
    %c0_i32 = arith.constant 0 : i32
    %c0_i32_0 = arith.constant 0 : i32
    return %arg0, %c0_i32 : i32, i32
  }
  func.func @transform_2(%arg0: i32) -> (i32, i32) {
    %c0_i32 = arith.constant 0 : i32
    %c0_i32_0 = arith.constant 0 : i32
    %c0_i32_1 = arith.constant 0 : i32
    return %c0_i32, %c0_i32_0 : i32, i32
  }
  func.func @transform_3(%arg0: i32) -> (i32, i32) {
    %c0_i32 = arith.constant 0 : i32
    %c0_i32_0 = arith.constant 0 : i32
    %c0_i32_1 = arith.constant 0 : i32
    return %c0_i32, %c0_i32_0 : i32, i32
  }
  func.func @transform_4(%arg0: i32) -> (i32, i32) {
    %c0_i32 = arith.constant 0 : i32
    %c0_i32_0 = arith.constant 0 : i32
    %c0_i32_1 = arith.constant 0 : i32
    return %c0_i32, %c0_i32_0 : i32, i32
  }
  func.func @transform_5(%arg0: i32) -> (i32, i32) {
    %c0_i32 = arith.constant 0 : i32
    %c0_i32_0 = arith.constant 0 : i32
    %c0_i32_1 = arith.constant 0 : i32
    return %c0_i32, %c0_i32_0 : i32, i32
  }
  func.func @transform_6(%arg0: i32) -> (i32, i32) {
    %c0_i32 = arith.constant 0 : i32
    %c0_i32_0 = arith.constant 0 : i32
    %c0_i32_1 = arith.constant 0 : i32
    return %c0_i32, %c0_i32_0 : i32, i32
  }
  func.func @transform_7(%arg0: i32) -> (i32, i32) {
    %c0_i32 = arith.constant 0 : i32
    %c0_i32_0 = arith.constant 0 : i32
    %c0_i32_1 = arith.constant 0 : i32
    return %c0_i32, %c0_i32_0 : i32, i32
  }
  func.func @transform_8(%arg0: i32) -> (i32, i32) {
    %c0_i32 = arith.constant 0 : i32
    %c0_i32_0 = arith.constant 0 : i32
    return %arg0, %c0_i32 : i32, i32
  }
}

</mosaic_0001>

<bundles_post_ra>
// kernel: tpu_custom_call.1
= control target key start
LH: loop header
LB: loop body
LE: loop exit
PB: predicated region body
PF: predicated region fallthrough
CT: control target
= control target key end

     0   :  { %14 = vsyncpa [#allocation4], 0  ;;  %s877_s0 = inlined_call_operand.<no memory space> [shape: f32[1,1], index: 0, kind: input, shape index: {}]   ;;  %s878_s1 = inlined_call_operand.hbm [shape: bf16[8,128], index: 1, kind: input, shape index: {}]   ;;  %s879_s2 = inlined_call_operand.hbm [shape: bf16[128,128], index: 2, kind: input, shape index: {}]   ;;  %s880_s3 = inlined_call_operand.vmem [shape: f32[1,128], index: 3, kind: input, shape index: {}]   ;;  %s881_s4 = inlined_call_operand.hbm [shape: bf16[128,128], index: 4, kind: input, shape index: {}]   ;;  %s882_s5 = inlined_call_operand.vmem [shape: f32[1,128], index: 5, kind: input, shape index: {}]   ;;  %s883_s6 = inlined_call_operand.hbm [shape: bf16[128,128], index: 6, kind: input, shape index: {}]   ;;  %s884_s7 = inlined_call_operand.vmem [shape: f32[1,128], index: 7, kind: input, shape index: {}]   ;;  %s885_s8 = inlined_call_operand.hbm [shape: f32[8,128], index: 8, kind: output, shape index: {}]  }
   0x1   :  { %15 = vsyncpa [#allocation7], 0 }
   0x2   :  { %16 = vsyncpa [#allocation10], 0 }
   0x3   :  { %17 = vsyncpa [#allocation5], 0  ;;  %s712_s27 = smov [#allocation6]   ;;  %s594_s9 = scalar_lea.hbm %s879_s2, 1024 }
   0x4   :  { %s35_s28 = sshll.u32 %s712_s27, 4  ;;  %p595_p0 = scmp.ne.s32.totalorder %s879_s2, %s594_s9  ;;  %s36_s28 = int_to_ptr.vmem [resolvable:$true] %s35_s28 }
   0x5   :  { %p598_p1 = scmp.lt.u32.totalorder %s594_s9, %s879_s2 }
   0x7   :  { %p600_p2 = pnand %p598_p1, %p595_p0 }
   0x9   :  { %603 = shalt.err (!%p600_p2)
}
   0xa   :  { %s604_s14 = scalar_lea.vmem %s36_s28, 1024  ;;  %p609_p4 = scmp.lt.s32.totalorder %s36_s28, %s36_s28 }
   0xb   :  { %p605_p3 = scmp.ne.s32.totalorder %s36_s28, %s604_s14  ;;  %p610_p5 = scmp.lt.s32.totalorder %s604_s14, %s604_s14 }
   0xd   :  { %p611_p6 = por %p610_p5, %p609_p4 }
   0xf   :  { %p612_p7 = pnand %p611_p6, %p605_p3 }
  0x11   :  { %615 = shalt.err (!%p612_p7)
}
  0x12   :  { %s713_s15 = smov 64   ;;  %s714_s16 = smov 4  }
  0x13   :  { %41 = dma.hbm_to_vmem [thread:$0]  %s879_s2, 1024, %s36_s28, [#allocation7], %s713_s15, %s713_s15, %s714_s16  }
  0x14   :  { %s715_s19 = smov [#allocation3]   ;;  %s716_s21 = smov [#allocation8]  }
  0x15   :  { %s26_s20 = sshll.u32 %s715_s19, 4  ;;  %s49_s22 = sshll.u32 %s716_s21, 4  ;;  %s27_s20 = int_to_ptr.vmem [resolvable:$true] %s26_s20  ;;  %s50_s22 = int_to_ptr.vmem [resolvable:$true] %s49_s22 }
  0x16   :  { %s616_s25 = scalar_lea.hbm %s878_s1, 64 }
  0x17   :  { %p617_p8 = scmp.ne.s32.totalorder %s878_s1, %s616_s25  ;;  %p620_p9 = scmp.lt.u32.totalorder %s616_s25, %s878_s1 }
  0x19   :  { %p622_p10 = pnand %p620_p9, %p617_p8 }
  0x1b   :  { %625 = shalt.err (!%p622_p10)
}
  0x1c   :  { %s626_s2 = scalar_lea.vmem %s27_s20, 64  ;;  %p631_p12 = scmp.lt.s32.totalorder %s27_s20, %s27_s20 }
  0x1d   :  { %p627_p11 = scmp.ne.s32.totalorder %s27_s20, %s626_s2  ;;  %p632_p13 = scmp.lt.s32.totalorder %s626_s2, %s626_s2 }
  0x1f   :  { %p633_p0 = por %p632_p13, %p631_p12 }
  0x21   :  { %p634_p1 = pnand %p633_p0, %p627_p11 }
  0x23   :  { %637 = shalt.err (!%p634_p1)
}
  0x24   :  { %29 = dma.hbm_to_vmem [thread:$0]  %s878_s1, 64, %s27_s20, [#allocation4]  }
  0x25   :  { %s638_s12 = scalar_lea.hbm %s881_s4, 1024 }
  0x26   :  { %p639_p2 = scmp.ne.s32.totalorder %s881_s4, %s638_s12  ;;  %p642_p3 = scmp.lt.u32.totalorder %s638_s12, %s881_s4 }
  0x28   :  { %p644_p4 = pnand %p642_p3, %p639_p2 }
  0x2a   :  { %647 = shalt.err (!%p644_p4)
}
  0x2b   :  { %s648_s19 = scalar_lea.vmem %s50_s22, 1024  ;;  %p653_p6 = scmp.lt.s32.totalorder %s50_s22, %s50_s22 }
  0x2c   :  { %p649_p5 = scmp.ne.s32.totalorder %s50_s22, %s648_s19  ;;  %p654_p7 = scmp.lt.s32.totalorder %s648_s19, %s648_s19 }
  0x2e   :  { %p655_p8 = por %p654_p7, %p653_p6 }
  0x30   :  { %p656_p9 = pnand %p655_p8, %p649_p5 }
  0x32   :  { %659 = shalt.err (!%p656_p9)
}
  0x33   :  { %55 = dma.hbm_to_vmem [thread:$0]  %s881_s4, 1024, %s50_s22, [#allocation7], %s713_s15, %s713_s15, %s714_s16  }
  0x34   :  { %s717_s21 = smov [#allocation9]   ;;  %s660_s26 = scalar_lea.hbm %s883_s6, 1024 }
  0x35   :  { %s63_s23 = sshll.u32 %s717_s21, 4  ;;  %p661_p10 = scmp.ne.s32.totalorder %s883_s6, %s660_s26  ;;  %s64_s23 = int_to_ptr.vmem [resolvable:$true] %s63_s23 }
  0x36   :  { %p664_p11 = scmp.lt.u32.totalorder %s660_s26, %s883_s6 }
  0x38   :  { %p666_p12 = pnand %p664_p11, %p661_p10 }
  0x3a   :  { %669 = shalt.err (!%p666_p12)
}
  0x3b   :  { %s670_s28 = scalar_lea.vmem %s64_s23, 1024  ;;  %p675_p0 = scmp.lt.s32.totalorder %s64_s23, %s64_s23 }
  0x3c   :  { %p671_p13 = scmp.ne.s32.totalorder %s64_s23, %s670_s28  ;;  %p676_p1 = scmp.lt.s32.totalorder %s670_s28, %s670_s28 }
  0x3e   :  { %p677_p2 = por %p676_p1, %p675_p0 }
  0x40   :  { %p678_p3 = pnand %p677_p2, %p671_p13 }
  0x42   :  { %681 = shalt.err (!%p678_p3)
}
  0x43   :  { %69 = dma.hbm_to_vmem [thread:$0]  %s883_s6, 1024, %s64_s23, [#allocation10], %s713_s15, %s713_s15, %s714_s16  }
  0x44   :  { %704 = dma.done.wait [#allocation4], 64  }
  0x45   :  { %705 = vsyncadd [#allocation4], 4294967232 }
  0x46   :  { %706 = dma.done.wait [#allocation7], 2048  }
  0x47   :  { %707 = vsyncadd [#allocation7], 4294965248 }
  0x48   :  { %708 = dma.done.wait [#allocation10], 1024  }
  0x49   :  { %709 = vsyncadd [#allocation10], 4294966272  ;;  %v718_v0 = vmov 0.0   ;;  %vm719_vm0 = vmmov 0   ;;  %v568_v1 = vld [vmem:[#allocation6] sm:$0xff]   ;;  %v569_v2 = vld [vmem:[#allocation6 + $0x8] sm:$0xff]   ;;  %v425_v48 = vstv %s877_s0 }
  0x4a   :  { %499 = vmatprep.subr.bf16.mxu0 %v718_v0  ;;  %515 = vmatprep.mubr.msk.bf16.mxu0 %vm719_vm0, %v718_v0  ;;  %v570_v3 = vld [vmem:[#allocation6 + $0x10] sm:$0xff]   ;;  %v576_v4 = vld [vmem:[#allocation8] sm:$0xff]   ;;  %v571_v5 = vld [vmem:[#allocation6 + $0x18] sm:$0xff]   ;;  %s720_s12 = smov [#allocation11]  }
  0x4b   :  { %519 = vmatprep.subr.bf16.mxu1 %v718_v0  ;;  %535 = vmatprep.mubr.msk.bf16.mxu1 %vm719_vm0, %v718_v0  ;;  %v577_v6 = vld [vmem:[#allocation8 + $0x8] sm:$0xff]   ;;  %v572_v7 = vld [vmem:[#allocation6 + $0x20] sm:$0xff]   ;;  %v578_v8 = vld [vmem:[#allocation8 + $0x10] sm:$0xff]   ;;  %s434_s13 = sshll.u32 %s720_s12, 4  ;;  %s435_s13 = int_to_ptr.vmem [resolvable:$true] %s434_s13 }
  0x4c   :  { %500 = vmatpush3.bf16.msra.mxu0 %v568_v1  ;;  %520 = vmatpush3.bf16.msra.mxu1 %v576_v4  ;;  %v573_v9 = vld [vmem:[#allocation6 + $0x28] sm:$0xff]   ;;  %v579_v10 = vld [vmem:[#allocation8 + $0x18] sm:$0xff]   ;;  %v574_v11 = vld [vmem:[#allocation6 + $0x30] sm:$0xff]   ;;  %s682_s14 = scalar_lea.vmem %s435_s13, 128  ;;  %p687_p5 = scmp.lt.s32.totalorder %s435_s13, %s435_s13 }
  0x4d   :  { %501 = vmatprep.subr.bf16.mxu0 %v718_v0  ;;  %521 = vmatprep.subr.bf16.mxu1 %v718_v0  ;;  %v580_v12 = vld [vmem:[#allocation8 + $0x20] sm:$0xff]   ;;  %v575_v13 = vld [vmem:[#allocation6 + $0x38] sm:$0xff]   ;;  %v581_v14 = vld [vmem:[#allocation8 + $0x28] sm:$0xff]   ;;  %p683_p4 = scmp.ne.s32.totalorder %s435_s13, %s682_s14  ;;  %p688_p6 = scmp.lt.s32.totalorder %s682_s14, %s682_s14 }
  0x4e   :  { %v85_v15 = vld [vmem:[#allocation3] sm:$0xf]  ;;  %v582_v16 = vld [vmem:[#allocation8 + $0x30] sm:$0xff]   ;;  %v584_v18 = vld [vmem:[#allocation9] sm:$0xff]  }
  0x4f   :  { %v583_v17 = vld [vmem:[#allocation8 + $0x38] sm:$0xff]   ;;  %v585_v19 = vld [vmem:[#allocation9 + $0x8] sm:$0xff]   ;;  %v586_v20 = vld [vmem:[#allocation9 + $0x10] sm:$0xff]   ;;  %p689_p7 = por %p688_p6, %p687_p5 }
  0x50   :  { %502 = vmatpush3.bf16.msra.mxu0 %v569_v2  ;;  %522 = vmatpush3.bf16.msra.mxu1 %v577_v6  ;;  %v587_v21 = vld [vmem:[#allocation9 + $0x18] sm:$0xff]   ;;  %v588_v22 = vld [vmem:[#allocation9 + $0x20] sm:$0xff]   ;;  %v589_v23 = vld [vmem:[#allocation9 + $0x28] sm:$0xff]  }
  0x51   :  { %503 = vmatprep.subr.bf16.mxu0 %v718_v0  ;;  %523 = vmatprep.subr.bf16.mxu1 %v718_v0  ;;  %v445_v24 = vld [vmem:[%s880_s3] ss:$0 sm:$0xff]  ;;  %v590_v32 = vld [vmem:[#allocation9 + $0x30] sm:$0xff]   ;;  %p690_p8 = pnand %p689_p7, %p683_p4 }
  0x52   :  { %v591_v33 = vld [vmem:[#allocation9 + $0x38] sm:$0xff]  }
  0x53   :  { %v454_v34 = vld [vmem:[%s882_s5] ss:$0 sm:$0xff] }
  0x54   :  { %504 = vmatpush3.bf16.msra.mxu0 %v570_v3  ;;  %524 = vmatpush3.bf16.msra.mxu1 %v578_v8  ;;  %v463_v42 = vld [vmem:[%s884_s7] ss:$0 sm:$0xff] }
  0x55   :  { %505 = vmatprep.subr.bf16.mxu0 %v718_v0  ;;  %525 = vmatprep.subr.bf16.mxu1 %v718_v0 }
  0x58   :  { %506 = vmatpush3.bf16.msra.mxu0 %v571_v5  ;;  %526 = vmatpush3.bf16.msra.mxu1 %v579_v10 }
  0x59   :  { %507 = vmatprep.subr.bf16.mxu0 %v718_v0  ;;  %527 = vmatprep.subr.bf16.mxu1 %v718_v0 }
  0x5c   :  { %508 = vmatpush3.bf16.msra.mxu0 %v572_v7  ;;  %528 = vmatpush3.bf16.msra.mxu1 %v580_v12 }
  0x5d   :  { %509 = vmatprep.subr.bf16.mxu0 %v718_v0  ;;  %529 = vmatprep.subr.bf16.mxu1 %v718_v0 }
  0x60   :  { %510 = vmatpush3.bf16.msra.mxu0 %v573_v9  ;;  %530 = vmatpush3.bf16.msra.mxu1 %v581_v14 }
  0x61   :  { %511 = vmatprep.subr.bf16.mxu0 %v718_v0  ;;  %531 = vmatprep.subr.bf16.mxu1 %v718_v0 }
  0x64   :  { %512 = vmatpush3.bf16.msra.mxu0 %v574_v11  ;;  %532 = vmatpush3.bf16.msra.mxu1 %v582_v16 }
  0x65   :  { %513 = vmatprep.subr.bf16.mxu0 %v718_v0  ;;  %533 = vmatprep.subr.bf16.mxu1 %v718_v0 }
  0x68   :  { %514 = vmatpush3.bf16.msra.mxu0 %v575_v13  ;;  %534 = vmatpush3.bf16.msra.mxu1 %v583_v17 }
  0x69   :  { %539 = vmatprep.subr.bf16.mxu0 %v718_v0 }
  0x6b   :  { %516 = vmatmul.mubr.bf16.vlgmr.msra.gmra.mrb[0].mxu0 %v85_v15 }
  0x6c   :  { %555 = vmatprep.mubr.msk.bf16.mxu0 %vm719_vm0, %v718_v0  ;;  %540 = vmatpush3.bf16.msra.mxu0 %v584_v18 }
  0x6d   :  { %541 = vmatprep.subr.bf16.mxu0 %v718_v0 }
  0x70   :  { %542 = vmatpush3.bf16.msra.mxu0 %v585_v19 }
  0x71   :  { %543 = vmatprep.subr.bf16.mxu0 %v718_v0 }
  0x74   :  { %544 = vmatpush3.bf16.msra.mxu0 %v586_v20 }
  0x75   :  { %545 = vmatprep.subr.bf16.mxu0 %v718_v0 }
  0x78   :  { %546 = vmatpush3.bf16.msra.mxu0 %v587_v21 }
  0x79   :  { %547 = vmatprep.subr.bf16.mxu0 %v718_v0 }
  0x7c   :  { %548 = vmatpush3.bf16.msra.mxu0 %v588_v22 }
  0x7d   :  { %549 = vmatprep.subr.bf16.mxu0 %v718_v0 }
  0x80   :  { %550 = vmatpush3.bf16.msra.mxu0 %v589_v23 }
  0x81   :  { %551 = vmatprep.subr.bf16.mxu0 %v718_v0 }
  0x84   :  { %552 = vmatpush3.bf16.msra.mxu0 %v590_v32 }
  0x85   :  { %553 = vmatprep.subr.bf16.mxu0 %v718_v0 }
  0x88   :  { %554 = vmatpush3.bf16.msra.mxu0 %v591_v33 }
 0x13e   :  { %v191_v25 = vpop.f32.mrb[0].mxu0 }
 0x13f   :  { %v192_v26 = vadd.f32 %v445_v24, %v191_v25  ;;  %v517_v27 = vpop.f32.mrb[1].mxu0 }
 0x140   :  { %v194_v28 = vpop.f32.mrb[2].mxu0 }
 0x141   :  { %v197_v29 = vmax.f32 %v192_v26, 0.0  ;;  %v518_v30 = vpop.f32.mrb[3].mxu0 }
 0x143   :  { %v198_v31 = vpack.c.bf16 %v197_v29, %v197_v29 }
 0x145   :  { %536 = vmatmul.mubr.bf16.vlgmr.msra.gmra.mrb[0].mxu1 %v198_v31 }
 0x218   :  { %v304_v35 = vpop.f32.mrb[0].mxu1 }
 0x219   :  { %v305_v36 = vadd.f32 %v454_v34, %v304_v35  ;;  %v537_v37 = vpop.f32.mrb[1].mxu1 }
 0x21a   :  { %v307_v38 = vpop.f32.mrb[2].mxu1 }
 0x21b   :  { %v310_v39 = vmax.f32 %v305_v36, 0.0  ;;  %v538_v40 = vpop.f32.mrb[3].mxu1 }
 0x21d   :  { %v311_v41 = vpack.c.bf16 %v310_v39, %v310_v39 }
 0x21f   :  { %556 = vmatmul.mubr.bf16.vlgmr.msra.gmra.mrb[4].mxu0 %v311_v41 }
 0x2f2   :  { %v417_v43 = vpop.f32.mrb[4].mxu0 }
 0x2f3   :  { %v418_v44 = vadd.f32 %v463_v42, %v417_v43  ;;  %v557_v45 = vpop.f32.mrb[5].mxu0 }
 0x2f4   :  { %v420_v46 = vpop.f32.mrb[6].mxu0 }
 0x2f5   :  { %592 = vtanh.f32 %v418_v44  ;;  %v558_v47 = vpop.f32.mrb[7].mxu0 }
 0x2ff   :  { %v593_v49 = vpop.eup %592 }
 0x300   :  { %v426_v50 = vmul.f32 %v593_v49, %v425_v48 }
 0x302   :  { %427 = vst [vmem:[#allocation11] sm:$0xff] %v426_v50 }
 0x303   :  { %693 = shalt.err (!%p690_p8)
}
 0x304   :  { %s694_s18 = scalar_lea.hbm %s885_s8, 128 }
 0x305   :  { %p695_p9 = scmp.ne.s32.totalorder %s885_s8, %s694_s18  ;;  %p698_p10 = scmp.lt.u32.totalorder %s694_s18, %s885_s8 }
 0x307   :  { %p700_p11 = pnand %p698_p10, %p695_p9 }
 0x309   :  { %703 = shalt.err (!%p700_p11)
}
 0x30a   :  { %437 = dma.vmem_to_hbm [thread:$0]  %s435_s13, 128, %s885_s8, [#allocation5]  }
 0x30b   :  { %710 = dma.done.wait [#allocation5], 128  }
 0x30c   :  { %711 = vsyncadd [#allocation5], 4294967168 }
 0x30d   :  { %441 = vsyncpa [#allocation4], 1 }
 0x30e   :  { %442 = vsyncpa [#allocation7], 1 }
 0x30f   :  { %443 = vsyncpa [#allocation10], 1 }
 0x310   :  { %444 = vsyncpa [#allocation5], 1 }

</bundles_post_ra>
